<compile_context>
chip_gen: v7x
topology: tpu7x:2x2x1
jax: 0.10.0
libtpu: 0.0.40
codegen_flags: <defaults>
</compile_context>

<pallas_src>
import jax
import jax.numpy as jnp
from jax.experimental import pallas as pl
from jax.experimental.pallas import tpu as pltpu

# Hidden widths of the IK fc1 stack (9 Linear layers total incl. in/out).
HIDDEN = [100, 100, 50, 50, 20, 20, 10, 10]
LANES = 128          # every layer width padded to one 128-lane register row
SUBTILE = 16         # bf16 sublane-tile granularity for weight-row packing


def _pad_to(n, m):
    return -(-n // m) * m


def _make_kernel(k_pads):
    """k_pads: static per-layer padded fan-in (row count in the weight slab)."""

    def kernel(xy_ref, w_ref, b_ref, o_ref):
        h = xy_ref[...]                                   # bf16 (bm, k_pads[0])
        off = 0
        for l, kp in enumerate(k_pads):
            w = w_ref[off:off + kp, :]                    # (kp, 128) bf16, 16-aligned
            lhs = h[:, :kp].astype(jnp.bfloat16)          # no-op for layer 1
            h = (jnp.dot(lhs, w, preferred_element_type=jnp.float32)
                 + b_ref[l:l + 1, :])                     # f32 accumulate + bias
            h = jnp.maximum(h, 0.01 * h)                  # LeakyReLU(0.01), f32
            off += kp
        o_ref[...] = h.astype(o_ref.dtype)                # lane-dense (bm, 128) store

    return kernel


def init_params(key, in_channels, out_channels):
    """Deterministic synthetic weights; w stored (in, out) == torch W.T."""
    widths = [in_channels] + HIDDEN + [out_channels]
    params = []
    for i in range(len(widths) - 1):
        fan_in, fan_out = widths[i], widths[i + 1]
        key, kw, kb = jax.random.split(key, 3)
        bound = 1.0 / jnp.sqrt(jnp.float32(fan_in))
        w = jax.random.uniform(kw, (fan_in, fan_out), jnp.float32, -bound, bound)
        b = jax.random.uniform(kb, (fan_out,), jnp.float32, -bound, bound)
        params.append((w, b))
    return params


def pack_params(params):
    """Pack all 9 (w, b) pairs into one bf16 weight slab + one f32 bias slab."""
    k_pads = [_pad_to(w.shape[0], SUBTILE) for w, _ in params]
    total_rows = sum(k_pads)                               # 464 for IK geometry

    w_slab = jnp.zeros((total_rows, LANES), jnp.float32)
    off = 0
    for (w, _), kp in zip(params, k_pads):
        w_slab = w_slab.at[off:off + w.shape[0], :w.shape[1]].set(w)
        off += kp
    w_slab = w_slab.astype(jnp.bfloat16)                   # (464, 128) ~116 KB

    n_rows = _pad_to(len(params), 8)
    b_slab = jnp.zeros((n_rows, LANES), jnp.float32)
    for l, (_, b) in enumerate(params):
        b_slab = b_slab.at[l, :b.shape[0]].set(b)

    # Dead-lane invariant: padded weight rows/cols AND padded bias lanes must
    # be exactly zero so dead lanes stay 0 through LeakyReLU (f(0)=0) and never
    # contaminate later layers.
    mask = jnp.zeros_like(b_slab, dtype=bool)
    for l, (_, b) in enumerate(params):
        mask = mask.at[l, :b.shape[0]].set(True)
    assert not bool(jnp.any(jnp.where(mask, 0.0, jnp.abs(b_slab)) > 0)), \
        "padded bias lanes must be zero"

    return w_slab, b_slab, k_pads


def ik_forward(x, y, w_slab, b_slab, k_pads, in_channels, out_channels,
               block_rows=512):
    """Mirrors IK.forward (concat -> view -> 9x Linear+LeakyReLU) in one pallas_call."""
    # concat(x, y, dim=1).view(-1, in_channels); tiny op, feed the kernel bf16.
    xy = jnp.concatenate([x.astype(jnp.bfloat16), y.astype(jnp.bfloat16)], axis=1)
    xy = xy.reshape(-1, in_channels)
    batch = xy.shape[0]

    k0 = k_pads[0]
    if in_channels < k0:                                   # pad lanes to 16-multiple
        xy = jnp.pad(xy, ((0, 0), (0, k0 - in_channels)))

    # Batch tiling: large tiles to amortize per-step overhead + the 9 serial
    # weight loads; >= 2 grid steps when batch >= 16 so v7x megacore shards.
    if batch < 16:
        bm, pad = batch, 0
    else:
        bm = min(block_rows, _pad_to((batch + 1) // 2, 8))
        pad = (-batch) % bm
        if pad:
            xy = jnp.pad(xy, ((0, pad), (0, 0)))
    padded_batch = batch + pad

    out = pl.pallas_call(
        _make_kernel(tuple(k_pads)),
        out_shape=jax.ShapeDtypeStruct((padded_batch, LANES), jnp.float32),
        grid=(padded_batch // bm,),
        in_specs=[
            pl.BlockSpec((bm, k0), lambda i: (i, 0)),
            pl.BlockSpec(w_slab.shape, lambda i: (0, 0)),   # VMEM-resident slabs
            pl.BlockSpec(b_slab.shape, lambda i: (0, 0)),
        ],
        out_specs=pl.BlockSpec((bm, LANES), lambda i: (i, 0)),
        compiler_params=pltpu.CompilerParams(
            dimension_semantics=("parallel",)),
    )(xy, w_slab, b_slab)
    return out[:batch, :out_channels]


def ik_reference(x, y, w_slab, b_slab, k_pads, in_channels, out_channels):
    """Plain-JAX reference using the same bf16-quantized params as the kernel."""
    xy = jnp.concatenate([x, y], axis=1).reshape(-1, in_channels)
    k0 = k_pads[0]
    h = jnp.pad(xy, ((0, 0), (0, k0 - in_channels))).astype(jnp.bfloat16)
    h = h.astype(jnp.float32)
    off = 0
    for l, kp in enumerate(k_pads):
        w = w_slab[off:off + kp, :].astype(jnp.float32)
        lhs = h[:, :kp].astype(jnp.bfloat16).astype(jnp.float32)
        h = lhs @ w + b_slab[l:l + 1, :]
        h = jnp.maximum(h, 0.01 * h)
        off += kp
    return h[:, :out_channels]


if __name__ == "__main__":
    in_channels = 16      # concat of x (8 feats) and y (8 feats)
    out_channels = 4
    batch = 8

    key = jax.random.PRNGKey(0)
    kx, ky, kp = jax.random.split(key, 3)
    x = jax.random.normal(kx, (batch, 8), jnp.float32)
    y = jax.random.normal(ky, (batch, 8), jnp.float32)

    params = init_params(kp, in_channels, out_channels)
    w_slab, b_slab, k_pads = pack_params(params)

    out = ik_forward(x, y, w_slab, b_slab, k_pads, in_channels, out_channels)
    out = jax.block_until_ready(out)

    ref = ik_reference(x, y, w_slab, b_slab, k_pads, in_channels, out_channels)
    assert out.shape == (batch, out_channels)
    assert jnp.allclose(out, ref, atol=1e-3, rtol=1e-2), (
        f"max abs err {jnp.max(jnp.abs(out - ref))}")

    print("KERNEL_OK")
</pallas_src>

<mosaic_0001>
module attributes {stable_mosaic.version = 11 : i64} {
  func.func @kernel(%arg0: i32, %arg1: memref<8x16xbf16, #tpu.memory_space<vmem>>, %arg2: memref<464x128xbf16, #tpu.memory_space<vmem>>, %arg3: memref<16x128xf32, #tpu.memory_space<vmem>>, %arg4: memref<8x128xf32, #tpu.memory_space<vmem>>) attributes {dimension_semantics = [#tpu.dimension_semantics<parallel>], iteration_bounds = array<i64: 1>, scalar_prefetch = 0 : i64, scratch_operands = 0 : i64, tpu.core_type = #tpu.core_type<tc>, window_params = [{transform_indices = @transform_0, window_bounds = array<i64: 8, 16>}, {pipeline_mode = #tpu.pipeline_mode<synchronous>, transform_indices = @transform_1, window_bounds = array<i64: 464, 128>}, {pipeline_mode = #tpu.pipeline_mode<synchronous>, transform_indices = @transform_2, window_bounds = array<i64: 16, 128>}, {transform_indices = @transform_3, window_bounds = array<i64: 8, 128>}]} {
    %c0 = arith.constant 0 : index
    %c0_0 = arith.constant 0 : index
    %0 = vector.load %arg1[%c0, %c0_0] : memref<8x16xbf16, #tpu.memory_space<vmem>>, vector<8x16xbf16>
    %c0_1 = arith.constant 0 : index
    %c0_2 = arith.constant 0 : index
    %1 = vector.load %arg2[%c0_1, %c0_2] : memref<464x128xbf16, #tpu.memory_space<vmem>>, vector<16x128xbf16>
    %cst = arith.constant dense<0.000000e+00> : vector<8x128xf32>
    %2 = tpu.matmul %0, %1, %cst {dimension_numbers = #tpu.dot_dimension_numbers<[1], [0], [0], [1], [0, 0, 1, 1], [], []>} : vector<8x16xbf16>, vector<16x128xbf16>, vector<8x128xf32> -> vector<8x128xf32>
    %c0_3 = arith.constant 0 : index
    %c0_4 = arith.constant 0 : index
    %3 = vector.load %arg3[%c0_3, %c0_4] : memref<16x128xf32, #tpu.memory_space<vmem>>, vector<1x128xf32>
    %4 = vector.broadcast %3 : vector<1x128xf32> to vector<8x128xf32>
    %5 = arith.addf %2, %4 : vector<8x128xf32>
    %cst_5 = arith.constant 0.00999999977 : f32
    %6 = vector.broadcast %cst_5 : f32 to vector<8x128xf32>
    %7 = arith.mulf %6, %5 : vector<8x128xf32>
    %8 = arith.maximumf %5, %7 : vector<8x128xf32>
    %c16 = arith.constant 16 : index
    %c0_6 = arith.constant 0 : index
    %9 = vector.load %arg2[%c16, %c0_6] : memref<464x128xbf16, #tpu.memory_space<vmem>>, vector<112x128xbf16>
    %10 = vector.extract_strided_slice %8 {offsets = [0, 0], sizes = [8, 112], strides = [1, 1]} : vector<8x128xf32> to vector<8x112xf32>
    %11 = arith.truncf %10 : vector<8x112xf32> to vector<8x112xbf16>
    %cst_7 = arith.constant dense<0.000000e+00> : vector<8x128xf32>
    %12 = tpu.matmul %11, %9, %cst_7 {dimension_numbers = #tpu.dot_dimension_numbers<[1], [0], [0], [1], [0, 0, 1, 1], [], []>} : vector<8x112xbf16>, vector<112x128xbf16>, vector<8x128xf32> -> vector<8x128xf32>
    %c1 = arith.constant 1 : index
    %c0_8 = arith.constant 0 : index
    %13 = vector.load %arg3[%c1, %c0_8] : memref<16x128xf32, #tpu.memory_space<vmem>>, vector<1x128xf32>
    %14 = vector.broadcast %13 : vector<1x128xf32> to vector<8x128xf32>
    %15 = arith.addf %12, %14 : vector<8x128xf32>
    %cst_9 = arith.constant 0.00999999977 : f32
    %16 = vector.broadcast %cst_9 : f32 to vector<8x128xf32>
    %17 = arith.mulf %16, %15 : vector<8x128xf32>
    %18 = arith.maximumf %15, %17 : vector<8x128xf32>
    %c128 = arith.constant 128 : index
    %c0_10 = arith.constant 0 : index
    %19 = vector.load %arg2[%c128, %c0_10] : memref<464x128xbf16, #tpu.memory_space<vmem>>, vector<112x128xbf16>
    %20 = vector.extract_strided_slice %18 {offsets = [0, 0], sizes = [8, 112], strides = [1, 1]} : vector<8x128xf32> to vector<8x112xf32>
    %21 = arith.truncf %20 : vector<8x112xf32> to vector<8x112xbf16>
    %cst_11 = arith.constant dense<0.000000e+00> : vector<8x128xf32>
    %22 = tpu.matmul %21, %19, %cst_11 {dimension_numbers = #tpu.dot_dimension_numbers<[1], [0], [0], [1], [0, 0, 1, 1], [], []>} : vector<8x112xbf16>, vector<112x128xbf16>, vector<8x128xf32> -> vector<8x128xf32>
    %c2 = arith.constant 2 : index
    %c0_12 = arith.constant 0 : index
    %23 = vector.load %arg3[%c2, %c0_12] : memref<16x128xf32, #tpu.memory_space<vmem>>, vector<1x128xf32>
    %24 = vector.broadcast %23 : vector<1x128xf32> to vector<8x128xf32>
    %25 = arith.addf %22, %24 : vector<8x128xf32>
    %cst_13 = arith.constant 0.00999999977 : f32
    %26 = vector.broadcast %cst_13 : f32 to vector<8x128xf32>
    %27 = arith.mulf %26, %25 : vector<8x128xf32>
    %28 = arith.maximumf %25, %27 : vector<8x128xf32>
    %c240 = arith.constant 240 : index
    %c0_14 = arith.constant 0 : index
    %29 = vector.load %arg2[%c240, %c0_14] : memref<464x128xbf16, #tpu.memory_space<vmem>>, vector<64x128xbf16>
    %30 = vector.extract_strided_slice %28 {offsets = [0, 0], sizes = [8, 64], strides = [1, 1]} : vector<8x128xf32> to vector<8x64xf32>
    %31 = arith.truncf %30 : vector<8x64xf32> to vector<8x64xbf16>
    %cst_15 = arith.constant dense<0.000000e+00> : vector<8x128xf32>
    %32 = tpu.matmul %31, %29, %cst_15 {dimension_numbers = #tpu.dot_dimension_numbers<[1], [0], [0], [1], [0, 0, 1, 1], [], []>} : vector<8x64xbf16>, vector<64x128xbf16>, vector<8x128xf32> -> vector<8x128xf32>
    %c3 = arith.constant 3 : index
    %c0_16 = arith.constant 0 : index
    %33 = vector.load %arg3[%c3, %c0_16] : memref<16x128xf32, #tpu.memory_space<vmem>>, vector<1x128xf32>
    %34 = vector.broadcast %33 : vector<1x128xf32> to vector<8x128xf32>
    %35 = arith.addf %32, %34 : vector<8x128xf32>
    %cst_17 = arith.constant 0.00999999977 : f32
    %36 = vector.broadcast %cst_17 : f32 to vector<8x128xf32>
    %37 = arith.mulf %36, %35 : vector<8x128xf32>
    %38 = arith.maximumf %35, %37 : vector<8x128xf32>
    %c304 = arith.constant 304 : index
    %c0_18 = arith.constant 0 : index
    %39 = vector.load %arg2[%c304, %c0_18] : memref<464x128xbf16, #tpu.memory_space<vmem>>, vector<64x128xbf16>
    %40 = vector.extract_strided_slice %38 {offsets = [0, 0], sizes = [8, 64], strides = [1, 1]} : vector<8x128xf32> to vector<8x64xf32>
    %41 = arith.truncf %40 : vector<8x64xf32> to vector<8x64xbf16>
    %cst_19 = arith.constant dense<0.000000e+00> : vector<8x128xf32>
    %42 = tpu.matmul %41, %39, %cst_19 {dimension_numbers = #tpu.dot_dimension_numbers<[1], [0], [0], [1], [0, 0, 1, 1], [], []>} : vector<8x64xbf16>, vector<64x128xbf16>, vector<8x128xf32> -> vector<8x128xf32>
    %c4 = arith.constant 4 : index
    %c0_20 = arith.constant 0 : index
    %43 = vector.load %arg3[%c4, %c0_20] : memref<16x128xf32, #tpu.memory_space<vmem>>, vector<1x128xf32>
    %44 = vector.broadcast %43 : vector<1x128xf32> to vector<8x128xf32>
    %45 = arith.addf %42, %44 : vector<8x128xf32>
    %cst_21 = arith.constant 0.00999999977 : f32
    %46 = vector.broadcast %cst_21 : f32 to vector<8x128xf32>
    %47 = arith.mulf %46, %45 : vector<8x128xf32>
    %48 = arith.maximumf %45, %47 : vector<8x128xf32>
    %c368 = arith.constant 368 : index
    %c0_22 = arith.constant 0 : index
    %49 = vector.load %arg2[%c368, %c0_22] : memref<464x128xbf16, #tpu.memory_space<vmem>>, vector<32x128xbf16>
    %50 = vector.extract_strided_slice %48 {offsets = [0, 0], sizes = [8, 32], strides = [1, 1]} : vector<8x128xf32> to vector<8x32xf32>
    %51 = arith.truncf %50 : vector<8x32xf32> to vector<8x32xbf16>
    %cst_23 = arith.constant dense<0.000000e+00> : vector<8x128xf32>
    %52 = tpu.matmul %51, %49, %cst_23 {dimension_numbers = #tpu.dot_dimension_numbers<[1], [0], [0], [1], [0, 0, 1, 1], [], []>} : vector<8x32xbf16>, vector<32x128xbf16>, vector<8x128xf32> -> vector<8x128xf32>
    %c5 = arith.constant 5 : index
    %c0_24 = arith.constant 0 : index
    %53 = vector.load %arg3[%c5, %c0_24] : memref<16x128xf32, #tpu.memory_space<vmem>>, vector<1x128xf32>
    %54 = vector.broadcast %53 : vector<1x128xf32> to vector<8x128xf32>
    %55 = arith.addf %52, %54 : vector<8x128xf32>
    %cst_25 = arith.constant 0.00999999977 : f32
    %56 = vector.broadcast %cst_25 : f32 to vector<8x128xf32>
    %57 = arith.mulf %56, %55 : vector<8x128xf32>
    %58 = arith.maximumf %55, %57 : vector<8x128xf32>
    %c400 = arith.constant 400 : index
    %c0_26 = arith.constant 0 : index
    %59 = vector.load %arg2[%c400, %c0_26] : memref<464x128xbf16, #tpu.memory_space<vmem>>, vector<32x128xbf16>
    %60 = vector.extract_strided_slice %58 {offsets = [0, 0], sizes = [8, 32], strides = [1, 1]} : vector<8x128xf32> to vector<8x32xf32>
    %61 = arith.truncf %60 : vector<8x32xf32> to vector<8x32xbf16>
    %cst_27 = arith.constant dense<0.000000e+00> : vector<8x128xf32>
    %62 = tpu.matmul %61, %59, %cst_27 {dimension_numbers = #tpu.dot_dimension_numbers<[1], [0], [0], [1], [0, 0, 1, 1], [], []>} : vector<8x32xbf16>, vector<32x128xbf16>, vector<8x128xf32> -> vector<8x128xf32>
    %c6 = arith.constant 6 : index
    %c0_28 = arith.constant 0 : index
    %63 = vector.load %arg3[%c6, %c0_28] : memref<16x128xf32, #tpu.memory_space<vmem>>, vector<1x128xf32>
    %64 = vector.broadcast %63 : vector<1x128xf32> to vector<8x128xf32>
    %65 = arith.addf %62, %64 : vector<8x128xf32>
    %cst_29 = arith.constant 0.00999999977 : f32
    %66 = vector.broadcast %cst_29 : f32 to vector<8x128xf32>
    %67 = arith.mulf %66, %65 : vector<8x128xf32>
    %68 = arith.maximumf %65, %67 : vector<8x128xf32>
    %c432 = arith.constant 432 : index
    %c0_30 = arith.constant 0 : index
    %69 = vector.load %arg2[%c432, %c0_30] : memref<464x128xbf16, #tpu.memory_space<vmem>>, vector<16x128xbf16>
    %70 = vector.extract_strided_slice %68 {offsets = [0, 0], sizes = [8, 16], strides = [1, 1]} : vector<8x128xf32> to vector<8x16xf32>
    %71 = arith.truncf %70 : vector<8x16xf32> to vector<8x16xbf16>
    %cst_31 = arith.constant dense<0.000000e+00> : vector<8x128xf32>
    %72 = tpu.matmul %71, %69, %cst_31 {dimension_numbers = #tpu.dot_dimension_numbers<[1], [0], [0], [1], [0, 0, 1, 1], [], []>} : vector<8x16xbf16>, vector<16x128xbf16>, vector<8x128xf32> -> vector<8x128xf32>
    %c7 = arith.constant 7 : index
    %c0_32 = arith.constant 0 : index
    %73 = vector.load %arg3[%c7, %c0_32] : memref<16x128xf32, #tpu.memory_space<vmem>>, vector<1x128xf32>
    %74 = vector.broadcast %73 : vector<1x128xf32> to vector<8x128xf32>
    %75 = arith.addf %72, %74 : vector<8x128xf32>
    %cst_33 = arith.constant 0.00999999977 : f32
    %76 = vector.broadcast %cst_33 : f32 to vector<8x128xf32>
    %77 = arith.mulf %76, %75 : vector<8x128xf32>
    %78 = arith.maximumf %75, %77 : vector<8x128xf32>
    %c448 = arith.constant 448 : index
    %c0_34 = arith.constant 0 : index
    %79 = vector.load %arg2[%c448, %c0_34] : memref<464x128xbf16, #tpu.memory_space<vmem>>, vector<16x128xbf16>
    %80 = vector.extract_strided_slice %78 {offsets = [0, 0], sizes = [8, 16], strides = [1, 1]} : vector<8x128xf32> to vector<8x16xf32>
    %81 = arith.truncf %80 : vector<8x16xf32> to vector<8x16xbf16>
    %cst_35 = arith.constant dense<0.000000e+00> : vector<8x128xf32>
    %82 = tpu.matmul %81, %79, %cst_35 {dimension_numbers = #tpu.dot_dimension_numbers<[1], [0], [0], [1], [0, 0, 1, 1], [], []>} : vector<8x16xbf16>, vector<16x128xbf16>, vector<8x128xf32> -> vector<8x128xf32>
    %c8 = arith.constant 8 : index
    %c0_36 = arith.constant 0 : index
    %83 = vector.load %arg3[%c8, %c0_36] : memref<16x128xf32, #tpu.memory_space<vmem>>, vector<1x128xf32>
    %84 = vector.broadcast %83 : vector<1x128xf32> to vector<8x128xf32>
    %85 = arith.addf %82, %84 : vector<8x128xf32>
    %cst_37 = arith.constant 0.00999999977 : f32
    %86 = vector.broadcast %cst_37 : f32 to vector<8x128xf32>
    %87 = arith.mulf %86, %85 : vector<8x128xf32>
    %88 = arith.maximumf %85, %87 : vector<8x128xf32>
    %c0_38 = arith.constant 0 : index
    %c0_39 = arith.constant 0 : index
    %89 = vector.load %arg4[%c0_38, %c0_39] : memref<8x128xf32, #tpu.memory_space<vmem>>, vector<8x128xf32>
    tpu.vector_store %arg4[%c0_38, %c0_39], %88 {strides = array<i32>} : memref<8x128xf32, #tpu.memory_space<vmem>>, vector<8x128xf32>,
    return
  }
  func.func @transform_0(%arg0: i32) -> (i32, i32) {
    %c0_i32 = arith.constant 0 : i32
    %c0_i32_0 = arith.constant 0 : i32
    return %arg0, %c0_i32 : i32, i32
  }
  func.func @transform_1(%arg0: i32) -> (i32, i32) {
    %c0_i32 = arith.constant 0 : i32
    %c0_i32_0 = arith.constant 0 : i32
    %c0_i32_1 = arith.constant 0 : i32
    return %c0_i32, %c0_i32_0 : i32, i32
  }
  func.func @transform_2(%arg0: i32) -> (i32, i32) {
    %c0_i32 = arith.constant 0 : i32
    %c0_i32_0 = arith.constant 0 : i32
    %c0_i32_1 = arith.constant 0 : i32
    return %c0_i32, %c0_i32_0 : i32, i32
  }
  func.func @transform_3(%arg0: i32) -> (i32, i32) {
    %c0_i32 = arith.constant 0 : i32
    %c0_i32_0 = arith.constant 0 : i32
    return %arg0, %c0_i32 : i32, i32
  }
}

</mosaic_0001>

<bundles_post_ra>
// kernel: tpu_custom_call.1
= control target key start
LH: loop header
LB: loop body
LE: loop exit
PB: predicated region body
PF: predicated region fallthrough
CT: control target
= control target key end

     0   :  { %8 = vsyncpa [#allocation3], 0  ;;  %s1213_s0 = inlined_call_operand.hbm [shape: bf16[8,16], index: 0, kind: input, shape index: {}]   ;;  %s1214_s1 = inlined_call_operand.hbm [shape: bf16[464,128], index: 1, kind: input, shape index: {}]   ;;  %s1215_s2 = inlined_call_operand.hbm [shape: f32[16,128], index: 2, kind: input, shape index: {}]   ;;  %s1216_s3 = inlined_call_operand.hbm [shape: f32[8,128], index: 3, kind: output, shape index: {}]  }
   0x1   :  { %9 = vsyncpa [#allocation6], 0 }
   0x2   :  { %10 = vsyncpa [#allocation4], 0  ;;  %s1079_s12 = smov [#allocation5]   ;;  %s985_s16 = scalar_lea.hbm %s1214_s1, 3712 }
   0x3   :  { %s26_s13 = sshll.u32 %s1079_s12, 4  ;;  %p986_p0 = scmp.ne.s32.totalorder %s1214_s1, %s985_s16  ;;  %s27_s13 = int_to_ptr.vmem [resolvable:$true] %s26_s13 }
   0x4   :  { %p989_p1 = scmp.lt.u32.totalorder %s985_s16, %s1214_s1 }
   0x6   :  { %p991_p2 = pnand %p989_p1, %p986_p0 }
   0x8   :  { %994 = shalt.err (!%p991_p2)
}
   0x9   :  { %s995_s21 = scalar_lea.vmem %s27_s13, 3712  ;;  %p1000_p4 = scmp.lt.s32.totalorder %s27_s13, %s27_s13 }
   0xa   :  { %p996_p3 = scmp.ne.s32.totalorder %s27_s13, %s995_s21  ;;  %p1001_p5 = scmp.lt.s32.totalorder %s995_s21, %s995_s21 }
   0xc   :  { %p1002_p6 = por %p1001_p5, %p1000_p4 }
   0xe   :  { %p1003_p7 = pnand %p1002_p6, %p996_p3 }
  0x10   :  { %1006 = shalt.err (!%p1003_p7)
}
  0x11   :  { %s1080_s22 = smov 64   ;;  %s1081_s23 = smov 4  }
  0x12   :  { %32 = dma.hbm_to_vmem [thread:$0]  %s1214_s1, 3712, %s27_s13, [#allocation6], %s1080_s22, %s1080_s22, %s1081_s23  }
  0x13   :  { %s1082_s26 = smov [#allocation2]   ;;  %s1083_s28 = smov [#allocation7]  }
  0x14   :  { %s17_s27 = sshll.u32 %s1082_s26, 4  ;;  %s38_s29 = sshll.u32 %s1083_s28, 4  ;;  %s18_s27 = int_to_ptr.vmem [resolvable:$true] %s17_s27  ;;  %s39_s29 = int_to_ptr.vmem [resolvable:$true] %s38_s29 }
  0x15   :  { %s1007_s5 = scalar_lea.hbm %s1213_s0, 64 }
  0x16   :  { %p1008_p8 = scmp.ne.s32.totalorder %s1213_s0, %s1007_s5  ;;  %p1011_p9 = scmp.lt.u32.totalorder %s1007_s5, %s1213_s0 }
  0x18   :  { %p1013_p10 = pnand %p1011_p9, %p1008_p8 }
  0x1a   :  { %1016 = shalt.err (!%p1013_p10)
}
  0x1b   :  { %s1017_s1 = scalar_lea.vmem %s18_s27, 64  ;;  %p1022_p12 = scmp.lt.s32.totalorder %s18_s27, %s18_s27 }
  0x1c   :  { %p1018_p11 = scmp.ne.s32.totalorder %s18_s27, %s1017_s1  ;;  %p1023_p13 = scmp.lt.s32.totalorder %s1017_s1, %s1017_s1 }
  0x1e   :  { %p1024_p0 = por %p1023_p13, %p1022_p12 }
  0x20   :  { %p1025_p1 = pnand %p1024_p0, %p1018_p11 }
  0x22   :  { %1028 = shalt.err (!%p1025_p1)
}
  0x23   :  { %20 = dma.hbm_to_vmem [thread:$0]  %s1213_s0, 64, %s18_s27, [#allocation3]  }
  0x24   :  { %s1029_s14 = scalar_lea.hbm %s1215_s2, 256 }
  0x25   :  { %p1030_p2 = scmp.ne.s32.totalorder %s1215_s2, %s1029_s14  ;;  %p1033_p3 = scmp.lt.u32.totalorder %s1029_s14, %s1215_s2 }
  0x27   :  { %p1035_p4 = pnand %p1033_p3, %p1030_p2 }
  0x29   :  { %1038 = shalt.err (!%p1035_p4)
}
  0x2a   :  { %s1039_s19 = scalar_lea.vmem %s39_s29, 256  ;;  %p1044_p6 = scmp.lt.s32.totalorder %s39_s29, %s39_s29 }
  0x2b   :  { %p1040_p5 = scmp.ne.s32.totalorder %s39_s29, %s1039_s19  ;;  %p1045_p7 = scmp.lt.s32.totalorder %s1039_s19, %s1039_s19 }
  0x2d   :  { %p1046_p8 = por %p1045_p7, %p1044_p6 }
  0x2f   :  { %p1047_p9 = pnand %p1046_p8, %p1040_p5 }
  0x31   :  { %1050 = shalt.err (!%p1047_p9)
}
  0x32   :  { %s1084_s0 = smov 128   ;;  %s1085_s20 = smov 8  }
  0x33   :  { %44 = dma.hbm_to_vmem [thread:$0]  %s1215_s2, 256, %s39_s29, [#allocation6], %s1084_s0, %s1084_s0, %s1085_s20  }
  0x34   :  { %1073 = dma.done.wait [#allocation3], 64  }
  0x35   :  { %1074 = vsyncadd [#allocation3], 4294967232 }
  0x36   :  { %1075 = dma.done.wait [#allocation6], 3968  }
  0x37   :  { %1076 = vsyncadd [#allocation6], 4294963328  ;;  %v1086_v0 = vmov 0.0   ;;  %vm1087_vm0 = vmmov 0   ;;  %v956_v1 = vld [vmem:[#allocation5] sm:$0xff]   ;;  %vm69_vm1 = vcmask 130048  }
  0x38   :  { %852 = vmatprep.subr.bf16.mxu0 %v1086_v0  ;;  %854 = vmatprep.mubr.msk.bf16.mxu0 %vm1087_vm0, %v1086_v0  ;;  %v55_v2 = vld [vmem:[#allocation2] sm:$0xf]  ;;  %v957_v3 = vld [vmem:[#allocation5 + $0x8] sm:$0xff]   ;;  %v958_v4 = vld [vmem:[#allocation5 + $0x10] sm:$0xff]   ;;  %vm177_vm2 = vcmask 916480   ;;  %vm368_vm3 = vcmask 523264  }
  0x39   :  { %858 = vmatprep.subr.bf16.mxu1 %v1086_v0  ;;  %872 = vmatprep.mubr.msk.bf16.mxu1 %vm1087_vm0, %v1086_v0  ;;  %v959_v5 = vld [vmem:[#allocation5 + $0x18] sm:$0xff]   ;;  %v960_v6 = vld [vmem:[#allocation5 + $0x20] sm:$0xff]   ;;  %v961_v7 = vld [vmem:[#allocation5 + $0x28] sm:$0xff]   ;;  %vm519_vm4 = vcmask 261120   ;;  %s1088_s2 = smov [#allocation8]  }
  0x3a   :  { %853 = vmatpush3.bf16.msra.mxu0 %v956_v1  ;;  %859 = vmatpush3.bf16.msra.mxu1 %v957_v3  ;;  %v962_v8 = vld [vmem:[#allocation5 + $0x30] sm:$0xff]   ;;  %v963_v9 = vld [vmem:[#allocation5 + $0x38] sm:$0xff]   ;;  %v964_v10 = vld [vmem:[#allocation5 + $0x40] sm:$0xff]   ;;  %s757_s23 = sshll.u32 %s1088_s2, 4  ;;  %s758_s23 = int_to_ptr.vmem [resolvable:$true] %s757_s23 }
  0x3b   :  { %876 = vmatprep.subr.bf16.mxu0 %v1086_v0  ;;  %860 = vmatprep.subr.bf16.mxu1 %v1086_v0  ;;  %v965_v11 = vld [vmem:[#allocation5 + $0x48] sm:$0xff]   ;;  %v966_v12 = vld [vmem:[#allocation5 + $0x50] sm:$0xff]   ;;  %v967_v13 = vld [vmem:[#allocation5 + $0x58] sm:$0xff]   ;;  %s1051_s24 = scalar_lea.vmem %s758_s23, 128  ;;  %p1056_p11 = scmp.lt.s32.totalorder %s758_s23, %s758_s23 }
  0x3c   :  { %v968_v14 = vld [vmem:[#allocation5 + $0x60] sm:$0xff]   ;;  %v767_v15 = vld [vmem:[#allocation7] ss:$0 sm:$0xff]  ;;  %v970_v25 = vld [vmem:[#allocation5 + $0x70] sm:$0xff]   ;;  %p1052_p10 = scmp.ne.s32.totalorder %s758_s23, %s1051_s24  ;;  %p1057_p12 = scmp.lt.s32.totalorder %s1051_s24, %s1051_s24 }
  0x3d   :  { %855 = vmatmul.mubr.msk.bf16.vlgmr.msra.gmra.mrb[0].mxu0 %vm69_vm1, %v55_v2  ;;  %v969_v24 = vld [vmem:[#allocation5 + $0x68] sm:$0xff]   ;;  %v971_v26 = vld [vmem:[#allocation5 + $0x78] sm:$0xff]   ;;  %v972_v27 = vld [vmem:[#allocation5 + $0x80] sm:$0xff]  }
  0x3e   :  { %890 = vmatprep.mubr.msk.bf16.mxu0 %vm1087_vm0, %v1086_v0  ;;  %861 = vmatpush3.bf16.msra.mxu1 %v958_v4  ;;  %v770_v28 = vld [vmem:[#allocation7 + $0x1] ss:$0 sm:$0xff]  ;;  %v974_v38 = vld [vmem:[#allocation5 + $0x90] sm:$0xff]   ;;  %v975_v39 = vld [vmem:[#allocation5 + $0x98] sm:$0xff]   ;;  %p1058_p13 = por %p1057_p12, %p1056_p11 }
  0x3f   :  { %862 = vmatprep.subr.bf16.mxu1 %v1086_v0  ;;  %877 = vmatpush3.bf16.msra.mxu0 %v964_v10  ;;  %v973_v37 = vld [vmem:[#allocation5 + $0x88] sm:$0xff]   ;;  %v976_v40 = vld [vmem:[#allocation5 + $0xa0] sm:$0xff]   ;;  %v978_v51 = vld [vmem:[#allocation5 + $0xb0] sm:$0xff]  }
  0x40   :  { %878 = vmatprep.subr.bf16.mxu0 %v1086_v0  ;;  %v779_v41 = vld [vmem:[#allocation7 + $0x2] ss:$0 sm:$0xff]  ;;  %v788_v52 = vld [vmem:[#allocation7 + $0x3] ss:$0 sm:$0xff]  ;;  %v979_v61 = vld [vmem:[#allocation5 + $0xb8] sm:$0xff]   ;;  %p1059_p0 = pnand %p1058_p13, %p1052_p10 }
  0x41   :  { %v977_v50 = vld [vmem:[#allocation5 + $0xa8] sm:$0xff]   ;;  %v980_v62 = vld [vmem:[#allocation5 + $0xc0] sm:$0xff]   ;;  %v982_v10 = vld [vmem:[#allocation5 + $0xd0] sm:$0xff]  }
  0x42   :  { %863 = vmatpush3.bf16.msra.mxu1 %v959_v5  ;;  %v794_v63 = vld [vmem:[#allocation7 + $0x4] ss:$0 sm:$0xff] }
  0x43   :  { %864 = vmatprep.subr.bf16.mxu1 %v1086_v0  ;;  %879 = vmatpush3.bf16.msra.mxu0 %v965_v11  ;;  %v800_v11 = vld [vmem:[#allocation7 + $0x5] ss:$0 sm:$0xff] }
  0x44   :  { %880 = vmatprep.subr.bf16.mxu0 %v1086_v0 }
  0x46   :  { %865 = vmatpush3.bf16.msra.mxu1 %v960_v6 }
  0x47   :  { %866 = vmatprep.subr.bf16.mxu1 %v1086_v0  ;;  %881 = vmatpush3.bf16.msra.mxu0 %v966_v12 }
  0x48   :  { %882 = vmatprep.subr.bf16.mxu0 %v1086_v0 }
  0x4a   :  { %867 = vmatpush3.bf16.msra.mxu1 %v961_v7 }
  0x4b   :  { %868 = vmatprep.subr.bf16.mxu1 %v1086_v0  ;;  %883 = vmatpush3.bf16.msra.mxu0 %v967_v13 }
  0x4c   :  { %884 = vmatprep.subr.bf16.mxu0 %v1086_v0 }
  0x4e   :  { %869 = vmatpush3.bf16.msra.mxu1 %v962_v8 }
  0x4f   :  { %870 = vmatprep.subr.bf16.mxu1 %v1086_v0  ;;  %885 = vmatpush3.bf16.msra.mxu0 %v968_v14 }
  0x50   :  { %886 = vmatprep.subr.bf16.mxu0 %v1086_v0 }
  0x52   :  { %871 = vmatpush3.bf16.msra.mxu1 %v963_v9  ;;  %v981_v9 = vld [vmem:[#allocation5 + $0xc8] sm:$0xff]  }
  0x53   :  { %894 = vmatprep.subr.bf16.mxu1 %v1086_v0  ;;  %887 = vmatpush3.bf16.msra.mxu0 %v969_v24 }
  0x54   :  { %888 = vmatprep.subr.bf16.mxu0 %v1086_v0 }
  0x57   :  { %889 = vmatpush3.bf16.msra.mxu0 %v970_v25 }
  0x58   :  { %906 = vmatprep.subr.bf16.mxu0 %v1086_v0 }
 0x110   :  { %v107_v16 = vpop.f32.mrb[0].mxu0 }
 0x111   :  { %v108_v17 = vadd.f32 %v767_v15, %v107_v16  ;;  %v856_v18 = vpop.f32.mrb[1].mxu0 }
 0x112   :  { %v110_v19 = vpop.f32.mrb[2].mxu0 }
 0x113   :  { %v113_v20 = vmul.f32 0.01, %v108_v17  ;;  %v857_v21 = vpop.f32.mrb[3].mxu0 }
 0x114   :  { %v804_v21 = vld [vmem:[#allocation7 + $0x6] ss:$0 sm:$0xff] }
 0x115   :  { %v114_v22 = vmax.f32 %v108_v17, %v113_v20  ;;  %v983_v20 = vld [vmem:[#allocation5 + $0xd8] sm:$0xff]  }
 0x117   :  { %v129_v23 = vpack.c.bf16 %v114_v22, %v114_v22 }
 0x119   :  { %873 = vmatmul.mubr.msk.bf16.vlgmr.msra.gmra.mrb[0].mxu1 %vm177_vm2, %v129_v23 }
 0x11a   :  { %902 = vmatprep.mubr.msk.bf16.mxu1 %vm1087_vm0, %v1086_v0  ;;  %895 = vmatpush3.bf16.msra.mxu1 %v971_v26 }
 0x11b   :  { %896 = vmatprep.subr.bf16.mxu1 %v1086_v0 }
 0x11e   :  { %897 = vmatpush3.bf16.msra.mxu1 %v972_v27 }
 0x11f   :  { %898 = vmatprep.subr.bf16.mxu1 %v1086_v0 }
 0x122   :  { %899 = vmatpush3.bf16.msra.mxu1 %v973_v37 }
 0x123   :  { %900 = vmatprep.subr.bf16.mxu1 %v1086_v0 }
 0x126   :  { %901 = vmatpush3.bf16.msra.mxu1 %v974_v38 }
 0x127   :  { %918 = vmatprep.subr.bf16.mxu1 %v1086_v0 }
 0x1ec   :  { %v215_v29 = vpop.f32.mrb[0].mxu1 }
 0x1ed   :  { %v216_v30 = vadd.f32 %v770_v28, %v215_v29  ;;  %v874_v31 = vpop.f32.mrb[1].mxu1 }
 0x1ee   :  { %v218_v32 = vpop.f32.mrb[2].mxu1  ;;  %v808_v31 = vld [vmem:[#allocation7 + $0x7] ss:$0 sm:$0xff] }
 0x1ef   :  { %v221_v33 = vmul.f32 0.01, %v216_v30  ;;  %v875_v34 = vpop.f32.mrb[3].mxu1 }
 0x1f1   :  { %v222_v35 = vmax.f32 %v216_v30, %v221_v33  ;;  %v984_v30 = vld [vmem:[#allocation5 + $0xe0] sm:$0xff]  }
 0x1f3   :  { %v237_v36 = vpack.c.bf16 %v222_v35, %v222_v35 }
 0x1f5   :  { %891 = vmatmul.mubr.msk.bf16.vlgmr.msra.gmra.mrb[4].mxu0 %vm177_vm2, %v237_v36 }
 0x1f6   :  { %914 = vmatprep.mubr.msk.bf16.mxu0 %vm1087_vm0, %v1086_v0  ;;  %907 = vmatpush3.bf16.msra.mxu0 %v975_v39  ;;  %v811_v39 = vld [vmem:[#allocation7 + $0x8] ss:$0 sm:$0xff] }
 0x1f7   :  { %908 = vmatprep.subr.bf16.mxu0 %v1086_v0 }
 0x1fa   :  { %909 = vmatpush3.bf16.msra.mxu0 %v976_v40 }
 0x1fb   :  { %910 = vmatprep.subr.bf16.mxu0 %v1086_v0 }
 0x1fe   :  { %911 = vmatpush3.bf16.msra.mxu0 %v977_v50 }
 0x1ff   :  { %912 = vmatprep.subr.bf16.mxu0 %v1086_v0 }
 0x202   :  { %913 = vmatpush3.bf16.msra.mxu0 %v978_v51 }
 0x203   :  { %926 = vmatprep.subr.bf16.mxu0 %v1086_v0 }
 0x2c8   :  { %v322_v42 = vpop.f32.mrb[4].mxu0 }
 0x2c9   :  { %v323_v43 = vadd.f32 %v779_v41, %v322_v42  ;;  %v892_v44 = vpop.f32.mrb[5].mxu0 }
 0x2ca   :  { %v325_v45 = vpop.f32.mrb[6].mxu0 }
 0x2cb   :  { %v328_v46 = vmul.f32 0.01, %v323_v43  ;;  %v893_v47 = vpop.f32.mrb[7].mxu0 }
 0x2cd   :  { %v329_v48 = vmax.f32 %v323_v43, %v328_v46 }
 0x2cf   :  { %v338_v49 = vpack.c.bf16 %v329_v48, %v329_v48 }
 0x2d1   :  { %903 = vmatmul.mubr.msk.bf16.vlgmr.msra.gmra.mrb[4].mxu1 %vm368_vm3, %v338_v49 }
 0x2d2   :  { %922 = vmatprep.mubr.msk.bf16.mxu1 %vm1087_vm0, %v1086_v0  ;;  %919 = vmatpush3.bf16.msra.mxu1 %v979_v61 }
 0x2d3   :  { %920 = vmatprep.subr.bf16.mxu1 %v1086_v0 }
 0x2d6   :  { %921 = vmatpush3.bf16.msra.mxu1 %v980_v62 }
 0x2d7   :  { %934 = vmatprep.subr.bf16.mxu1 %v1086_v0 }
 0x3a4   :  { %v406_v53 = vpop.f32.mrb[4].mxu1 }
 0x3a5   :  { %v407_v54 = vadd.f32 %v788_v52, %v406_v53  ;;  %v904_v55 = vpop.f32.mrb[5].mxu1 }
 0x3a6   :  { %v409_v56 = vpop.f32.mrb[6].mxu1 }
 0x3a7   :  { %v412_v57 = vmul.f32 0.01, %v407_v54  ;;  %v905_v58 = vpop.f32.mrb[7].mxu1 }
 0x3a9   :  { %v413_v59 = vmax.f32 %v407_v54, %v412_v57 }
 0x3ab   :  { %v422_v60 = vpack.c.bf16 %v413_v59, %v413_v59 }
 0x3ad   :  { %915 = vmatmul.mubr.msk.bf16.vlgmr.msra.gmra.mrb[8].mxu0 %vm368_vm3, %v422_v60 }
 0x3ae   :  { %930 = vmatprep.mubr.msk.bf16.mxu0 %vm1087_vm0, %v1086_v0  ;;  %927 = vmatpush3.bf16.msra.mxu0 %v981_v9 }
 0x3af   :  { %928 = vmatprep.subr.bf16.mxu0 %v1086_v0 }
 0x3b2   :  { %929 = vmatpush3.bf16.msra.mxu0 %v982_v10 }
 0x3b3   :  { %940 = vmatprep.subr.bf16.mxu0 %v1086_v0 }
 0x480   :  { %v489_v1 = vpop.f32.mrb[8].mxu0 }
 0x481   :  { %v490_v2 = vadd.f32 %v794_v63, %v489_v1  ;;  %v916_v3 = vpop.f32.mrb[9].mxu0 }
 0x482   :  { %v492_v4 = vpop.f32.mrb[10].mxu0 }
 0x483   :  { %v495_v5 = vmul.f32 0.01, %v490_v2  ;;  %v917_v6 = vpop.f32.mrb[11].mxu0 }
 0x485   :  { %v496_v7 = vmax.f32 %v490_v2, %v495_v5 }
 0x487   :  { %v501_v8 = vpack.c.bf16 %v496_v7, %v496_v7 }
 0x489   :  { %923 = vmatmul.mubr.msk.bf16.vlgmr.msra.gmra.mrb[8].mxu1 %vm519_vm4, %v501_v8 }
 0x48a   :  { %936 = vmatprep.mubr.msk.bf16.mxu1 %vm1087_vm0, %v1086_v0  ;;  %935 = vmatpush3.bf16.msra.mxu1 %v983_v20 }
 0x55c   :  { %v557_v12 = vpop.f32.mrb[8].mxu1 }
 0x55d   :  { %v558_v13 = vadd.f32 %v800_v11, %v557_v12  ;;  %v924_v14 = vpop.f32.mrb[9].mxu1 }
 0x55e   :  { %v560_v15 = vpop.f32.mrb[10].mxu1 }
 0x55f   :  { %v563_v16 = vmul.f32 0.01, %v558_v13  ;;  %v925_v17 = vpop.f32.mrb[11].mxu1 }
 0x561   :  { %v564_v18 = vmax.f32 %v558_v13, %v563_v16 }
 0x563   :  { %v569_v19 = vpack.c.bf16 %v564_v18, %v564_v18 }
 0x565   :  { %931 = vmatmul.mubr.msk.bf16.vlgmr.msra.gmra.mrb[12].mxu0 %vm519_vm4, %v569_v19 }
 0x566   :  { %942 = vmatprep.mubr.msk.bf16.mxu0 %vm1087_vm0, %v1086_v0  ;;  %941 = vmatpush3.bf16.msra.mxu0 %v984_v30 }
 0x638   :  { %v624_v22 = vpop.f32.mrb[12].mxu0 }
 0x639   :  { %v625_v23 = vadd.f32 %v804_v21, %v624_v22  ;;  %v932_v24 = vpop.f32.mrb[13].mxu0 }
 0x63a   :  { %v627_v25 = vpop.f32.mrb[14].mxu0 }
 0x63b   :  { %v630_v26 = vmul.f32 0.01, %v625_v23  ;;  %v933_v27 = vpop.f32.mrb[15].mxu0 }
 0x63d   :  { %v631_v28 = vmax.f32 %v625_v23, %v630_v26 }
 0x63f   :  { %v634_v29 = vpack.c.bf16 %v631_v28, %v631_v28 }
 0x641   :  { %937 = vmatmul.mubr.msk.bf16.vlgmr.msra.gmra.mrb[12].mxu1 %vm69_vm1, %v634_v29 }
 0x714   :  { %v683_v32 = vpop.f32.mrb[12].mxu1 }
 0x715   :  { %v684_v33 = vadd.f32 %v808_v31, %v683_v32  ;;  %v938_v34 = vpop.f32.mrb[13].mxu1 }
 0x716   :  { %v686_v0 = vpop.f32.mrb[14].mxu1 }
 0x717   :  { %v689_v35 = vmul.f32 0.01, %v684_v33  ;;  %v939_v36 = vpop.f32.mrb[15].mxu1 }
 0x719   :  { %v690_v37 = vmax.f32 %v684_v33, %v689_v35 }
 0x71b   :  { %v693_v38 = vpack.c.bf16 %v690_v37, %v690_v37 }
 0x71d   :  { %943 = vmatmul.mubr.msk.bf16.vlgmr.msra.gmra.mrb[16].mxu0 %vm69_vm1, %v693_v38 }
 0x7f0   :  { %v742_v40 = vpop.f32.mrb[16].mxu0 }
 0x7f1   :  { %v743_v41 = vadd.f32 %v811_v39, %v742_v40  ;;  %v944_v42 = vpop.f32.mrb[17].mxu0 }
 0x7f2   :  { %v745_v43 = vpop.f32.mrb[18].mxu0 }
 0x7f3   :  { %v748_v44 = vmul.f32 0.01, %v743_v41  ;;  %v945_v45 = vpop.f32.mrb[19].mxu0 }
 0x7f5   :  { %v749_v46 = vmax.f32 %v743_v41, %v748_v44 }
 0x7f7   :  { %750 = vst [vmem:[#allocation8] sm:$0xff] %v749_v46 }
 0x7f8   :  { %1062 = shalt.err (!%p1059_p0)
}
 0x7f9   :  { %s1063_s27 = scalar_lea.hbm %s1216_s3, 128 }
 0x7fa   :  { %p1064_p1 = scmp.ne.s32.totalorder %s1216_s3, %s1063_s27  ;;  %p1067_p2 = scmp.lt.u32.totalorder %s1063_s27, %s1216_s3 }
 0x7fc   :  { %p1069_p3 = pnand %p1067_p2, %p1064_p1 }
 0x7fe   :  { %1072 = shalt.err (!%p1069_p3)
}
 0x7ff   :  { %760 = dma.vmem_to_hbm [thread:$0]  %s758_s23, 128, %s1216_s3, [#allocation4]  }
 0x800   :  { %1077 = dma.done.wait [#allocation4], 128  }
 0x801   :  { %1078 = vsyncadd [#allocation4], 4294967168 }
 0x802   :  { %764 = vsyncpa [#allocation3], 1 }
 0x803   :  { %765 = vsyncpa [#allocation6], 1 }
 0x804   :  { %766 = vsyncpa [#allocation4], 1 }

</bundles_post_ra>
